<compile_context>
chip_gen: v7x
topology: tpu7x:2x2x1
jax: 0.10.0
libtpu: 0.0.40
codegen_flags: <defaults>
</compile_context>

<pallas_src>
import math

import jax
import jax.numpy as jnp
import numpy as np
from jax.experimental import pallas as pl
from jax.experimental.pallas import tpu as pltpu


_INV_SQRT2 = 0.7071067811865476


def _erf_f32(z):
    """Abramowitz & Stegun 7.1.26 erf approximation (5 coefficients).

    |error| ~1e-4 with the EUP approx reciprocal - far below the bf16-matmul
    tolerance.  Reciprocal and exp run on the EUP, keeping VALU slots free.
    """
    az = jnp.abs(z)
    t = pl.reciprocal(1.0 + 0.3275911 * az, approx=True)
    poly = t * (0.254829592 + t * (-0.284496736 + t * (1.421413741 + t * (
        -1.453152027 + t * 1.061405429))))
    e = 1.0 - poly * jnp.exp(-az * az)
    return jnp.where(z >= 0.0, e, -e)


def _gelu_exact_f32(x):
    """torch.nn.functional.gelu (approximate='none') equivalent, in f32."""
    return 0.5 * x * (1.0 + _erf_f32(x * _INV_SQRT2))


# ------------------------------ fused FFN kernel ------------------------------
def _ffn_kernel(x_ref, w1_ref, b1_ref, w2_ref, b2_ref, o_ref, acc_ref):
    """One (tm, in) row tile x one hid chunk:
         acc += gelu(x @ W1[:, h] + b1[h]) @ W2[h, :]
       finalize (last hid chunk): o = acc + b2.  Dropout == identity (eval)."""
    h = pl.program_id(1)

    @pl.when(h == 0)
    def _():
        acc_ref[...] = jnp.zeros_like(acc_ref)

    # fc1 on the MXU (bf16 operands, f32 accumulation), exact GELU in f32.
    z = jnp.dot(x_ref[...], w1_ref[...], preferred_element_type=jnp.float32)
    z = _gelu_exact_f32(z + b1_ref[...])
    # fc2 chunk on the MXU, accumulate in f32.
    acc_ref[...] += jnp.dot(z.astype(w2_ref.dtype), w2_ref[...],
                            preferred_element_type=jnp.float32)

    @pl.when(h == pl.num_programs(1) - 1)
    def _():
        o_ref[...] = (acc_ref[...] + b2_ref[...]).astype(o_ref.dtype)


# ------------------------------- tiling helpers --------------------------------
def _round_up(v, m):
    return -(-v // m) * m


def _vmem_capacity_bytes():
    """Physical VMEM per TensorCore, with a device_kind-based fallback."""
    mib = 1024 * 1024
    try:
        cap = getattr(pltpu.get_tpu_info(), "vmem_capacity_bytes", None)
        if cap:
            return int(cap)
    except Exception:
        pass
    try:
        kind = jax.devices()[0].device_kind.lower()
        return 64 * mib if "v7" in kind else 128 * mib
    except Exception:
        return 64 * mib


def _pick_tiles(M, in_dim, hid_dim, out_pad, w_isz, x_isz, o_isz, budget):
    """Pick (tm, th): row tile and hid-chunk tile.

    tm: target >= 8 grid steps along rows (>= 4 per TensorCore on v7x) so the
        x/y DMA overlaps compute; prefer >= 256 rows when M is large
        (v6e/v7x MXUs are 2x256^2).
    th: keep the full hid resident (weights single-buffered) when it fits the
        budget; otherwise halve in multiples of 128 so weight chunks stream
        along an 'arbitrary' reduction axis with an f32 accumulator.
    """
    if M > 64:
        tm_cap = max(256 if M >= 2048 else 8, (M // 8) // 8 * 8)
    else:
        tm_cap = _round_up(M, 8)
    tm_cap = min(tm_cap, 1024)
    tm_cands = [c for c in (1024, 512, 256, 128, 64, 32, 16, 8) if c <= tm_cap]
    if not tm_cands:
        tm_cands = [tm_cap]

    th = hid_dim
    while True:
        n_h = -(-hid_dim // th)
        wbuf = 1 if n_h == 1 else 2          # single-buffer only when resident
        w_bytes = wbuf * ((in_dim + out_pad) * th * w_isz + th * 4) + out_pad * 4
        for tm in tm_cands:
            per_tile = (2 * tm * in_dim * x_isz       # x tile (double-buffered)
                        + 2 * tm * out_pad * o_isz    # y tile (double-buffered)
                        + 2 * tm * th * 4             # f32 z intermediate + temps
                        + tm * out_pad * 4)           # f32 accumulator scratch
            if w_bytes + per_tile <= budget:
                return tm, th, w_bytes + per_tile
        if th <= 128:
            tm = tm_cands[-1]
            per_tile = (2 * tm * in_dim * x_isz + 2 * tm * out_pad * o_isz
                        + 2 * tm * th * 4 + tm * out_pad * 4)
            return tm, th, w_bytes + per_tile
        th = max(128, _round_up(th // 2, 128))


# ---------------------------------- wrapper -------------------------------------
def feed_forward_layer(x, params, *, matmul_dtype=jnp.bfloat16,
                       single_buffer_weights=True):
    """y = fc2(dropout(gelu(fc1(x)))) over the last axis of x, fused in one kernel."""
    w1, b1 = params["fc1"]["w"], params["fc1"]["b"]
    w2, b2 = params["fc2"]["w"], params["fc2"]["b"]
    in_dim, hid_dim = w1.shape
    out_dim = w2.shape[1]
    assert x.shape[-1] == in_dim

    lead = x.shape[:-1]
    M = math.prod(lead) if lead else 1
    out_dtype = x.dtype

    # Lane-dense output: pad fc2's N to a multiple of 128 so stores are
    # full-lane unmasked vst; the wrapper slices the padding off afterwards.
    out_pad = _round_up(out_dim, 128)

    vmem_cap = _vmem_capacity_bytes()
    tm, th, vmem_need = _pick_tiles(
        M, in_dim, hid_dim, out_pad,
        np.dtype(matmul_dtype).itemsize, np.dtype(matmul_dtype).itemsize,
        np.dtype(out_dtype).itemsize,
        budget=int(vmem_cap * 0.7))
    n_h = -(-hid_dim // th)
    hid_pad = n_h * th

    # MXU-native operand dtype; biases and accumulation stay f32.
    w1c = w1.astype(matmul_dtype)
    w2c = w2.astype(matmul_dtype)
    b1r = b1.astype(jnp.float32).reshape(1, hid_dim)
    b2r = b2.astype(jnp.float32).reshape(1, out_dim)
    if hid_pad != hid_dim:                       # zero-pad hid (exact: gelu(0)=0)
        w1c = jnp.pad(w1c, ((0, 0), (0, hid_pad - hid_dim)))
        b1r = jnp.pad(b1r, ((0, 0), (0, hid_pad - hid_dim)))
        w2c = jnp.pad(w2c, ((0, hid_pad - hid_dim), (0, 0)))
    if out_pad != out_dim:
        w2c = jnp.pad(w2c, ((0, 0), (0, out_pad - out_dim)))
        b2r = jnp.pad(b2r, ((0, 0), (0, out_pad - out_dim)))

    # DMA the activation tiles in the MXU dtype (halves x-tile HBM bytes).
    x2 = x.reshape(M, in_dim).astype(matmul_dtype)
    n_m = -(-M // tm)
    m_pad = n_m * tm
    if m_pad != M:
        x2 = jnp.pad(x2, ((0, m_pad - M), (0, 0)))

    vmem_limit = int(min(vmem_cap * 0.8,
                         max(1.25 * vmem_need + 4 * 1024 * 1024,
                             32 * 1024 * 1024)))

    resident = single_buffer_weights and (n_h == 1)

    def _spec(shape, index_map, single):
        if single:
            return pl.BlockSpec(shape, index_map, pipeline_mode=pl.Buffered(1))
        return pl.BlockSpec(shape, index_map)

    out = pl.pallas_call(
        _ffn_kernel,
        out_shape=jax.ShapeDtypeStruct((m_pad, out_pad), out_dtype),
        grid=(n_m, n_h),
        in_specs=[
            pl.BlockSpec((tm, in_dim), lambda i, h: (i, 0)),                   # x rows
            _spec((in_dim, th), lambda i, h: (0, h), resident),                # W1 chunk
            _spec((1, th), lambda i, h: (0, h), resident),                     # b1 chunk
            _spec((th, out_pad), lambda i, h: (h, 0), resident),               # W2 chunk
            _spec((1, out_pad), lambda i, h: (0, 0), single_buffer_weights),   # b2
        ],
        out_specs=pl.BlockSpec((tm, out_pad), lambda i, h: (i, 0)),
        scratch_shapes=[pltpu.VMEM((tm, out_pad), jnp.float32)],
        compiler_params=pltpu.CompilerParams(
            dimension_semantics=("parallel", "arbitrary"),
            vmem_limit_bytes=vmem_limit),
    )(x2, w1c, b1r, w2c, b2r)

    out = out[:M, :out_dim]
    return out.reshape(*lead, out_dim)


# --------------------------------- reference ------------------------------------
def _reference(x, params, matmul_dtype):
    """Pure-JAX reference with the same bf16 operand rounding as the kernel."""
    def q(a):
        return a.astype(matmul_dtype).astype(jnp.float32)
    in_dim = params["fc1"]["w"].shape[0]
    lead = x.shape[:-1]
    x2 = x.reshape(-1, in_dim)
    z = jnp.dot(q(x2), q(params["fc1"]["w"])) + params["fc1"]["b"]
    z = jax.nn.gelu(z, approximate=False)            # exact erf GELU, like torch F.gelu
    y = jnp.dot(q(z), q(params["fc2"]["w"])) + params["fc2"]["b"]
    return y.reshape(*lead, -1)


# ----------------------------------- main ----------------------------------------
if __name__ == "__main__":
    # Shapes consistent with the module: x_hid = (batch, seq, nodes, in_dim),
    # FeedForwardLayer acts on the last dim.  expansion_factor=4, dropout=0.
    batch, seq, nodes = 2, 8, 16
    in_dim, out_dim, expansion_factor = 32, 32, 4
    hid_dim = in_dim * expansion_factor

    key = jax.random.PRNGKey(0)
    k1, k2, k3, k4, kx = jax.random.split(key, 5)
    lim1 = 1.0 / math.sqrt(in_dim)      # nn.Linear default init bounds
    lim2 = 1.0 / math.sqrt(hid_dim)
    params = {
        "fc1": {"w": jax.random.uniform(k1, (in_dim, hid_dim), jnp.float32, -lim1, lim1),
                "b": jax.random.uniform(k2, (hid_dim,), jnp.float32, -lim1, lim1)},
        "fc2": {"w": jax.random.uniform(k3, (hid_dim, out_dim), jnp.float32, -lim2, lim2),
                "b": jax.random.uniform(k4, (out_dim,), jnp.float32, -lim2, lim2)},
    }
    x = jax.random.normal(kx, (batch, seq, nodes, in_dim), jnp.float32)

    def run(single_buffer_weights):
        fwd = jax.jit(lambda xx, pp: feed_forward_layer(
            xx, pp, matmul_dtype=jnp.bfloat16,
            single_buffer_weights=single_buffer_weights))
        y = fwd(x, params)
        jax.block_until_ready(y)
        return y

    try:
        y = run(True)
    except Exception:
        # Fallback in case this JAX build rejects Buffered(1) on resident weights.
        y = run(False)

    assert y.shape == (batch, seq, nodes, out_dim), y.shape
    y_ref = _reference(x, params, jnp.bfloat16)
    max_err = float(jnp.max(jnp.abs(y.astype(jnp.float32) - y_ref)))
    assert math.isfinite(max_err) and max_err < 3e-2, f"max abs err {max_err}"
    print("KERNEL_OK")
</pallas_src>

<mosaic_0001>
module attributes {stable_mosaic.version = 11 : i64} {
  func.func @_ffn_kernel(%arg0: i32, %arg1: i32, %arg2: memref<32x32xbf16, #tpu.memory_space<vmem>>, %arg3: memref<32x128xbf16, #tpu.memory_space<vmem>>, %arg4: memref<1x128xf32, #tpu.memory_space<vmem>>, %arg5: memref<128x128xbf16, #tpu.memory_space<vmem>>, %arg6: memref<1x128xf32, #tpu.memory_space<vmem>>, %arg7: memref<32x128xf32, #tpu.memory_space<vmem>>, %arg8: memref<32x128xf32, #tpu.memory_space<vmem>>) attributes {dimension_semantics = [#tpu.dimension_semantics<parallel>, #tpu.dimension_semantics<arbitrary>], iteration_bounds = array<i64: 8, 1>, scalar_prefetch = 0 : i64, scratch_operands = 1 : i64, tpu.core_type = #tpu.core_type<tc>, window_params = [{transform_indices = @transform_0, window_bounds = array<i64: 32, 32>}, {pipeline_mode = #tpu.pipeline_mode<synchronous>, transform_indices = @transform_1, window_bounds = array<i64: 32, 128>}, {pipeline_mode = #tpu.pipeline_mode<synchronous>, transform_indices = @transform_2, window_bounds = array<i64: 1, 128>}, {pipeline_mode = #tpu.pipeline_mode<synchronous>, transform_indices = @transform_3, window_bounds = array<i64: 128, 128>}, {pipeline_mode = #tpu.pipeline_mode<synchronous>, transform_indices = @transform_4, window_bounds = array<i64: 1, 128>}, {transform_indices = @transform_5, window_bounds = array<i64: 32, 128>}]} {
    %c0_i32 = arith.constant 0 : i32
    %0 = arith.cmpi eq, %arg1, %c0_i32 : i32
    %1 = arith.extui %0 : i1 to i32
    %c0_i32_0 = arith.constant 0 : i32
    %2 = arith.cmpi ne, %1, %c0_i32_0 : i32
    scf.if %2 {
      %cst_29 = arith.constant 0.000000e+00 : f32
      %57 = vector.broadcast %cst_29 : f32 to vector<32x128xf32>
      %c0_30 = arith.constant 0 : index
      %c0_31 = arith.constant 0 : index
      %58 = vector.load %arg8[%c0_30, %c0_31] : memref<32x128xf32, #tpu.memory_space<vmem>>, vector<32x128xf32>
      tpu.vector_store %arg8[%c0_30, %c0_31], %57 {strides = array<i32>} : memref<32x128xf32, #tpu.memory_space<vmem>>, vector<32x128xf32>,
    } else {
    }
    %c0 = arith.constant 0 : index
    %c0_1 = arith.constant 0 : index
    %3 = vector.load %arg2[%c0, %c0_1] : memref<32x32xbf16, #tpu.memory_space<vmem>>, vector<32x32xbf16>
    %c0_2 = arith.constant 0 : index
    %c0_3 = arith.constant 0 : index
    %4 = vector.load %arg3[%c0_2, %c0_3] : memref<32x128xbf16, #tpu.memory_space<vmem>>, vector<32x128xbf16>
    %cst = arith.constant dense<0.000000e+00> : vector<32x128xf32>
    %5 = tpu.matmul %3, %4, %cst {dimension_numbers = #tpu.dot_dimension_numbers<[1], [0], [0], [1], [0, 0, 1, 1], [], []>} : vector<32x32xbf16>, vector<32x128xbf16>, vector<32x128xf32> -> vector<32x128xf32>
    %c0_4 = arith.constant 0 : index
    %c0_5 = arith.constant 0 : index
    %6 = vector.load %arg4[%c0_4, %c0_5] : memref<1x128xf32, #tpu.memory_space<vmem>>, vector<1x128xf32>
    %7 = vector.broadcast %6 : vector<1x128xf32> to vector<32x128xf32>
    %8 = arith.addf %5, %7 : vector<32x128xf32>
    %cst_6 = arith.constant 5.000000e-01 : f32
    %9 = vector.broadcast %cst_6 : f32 to vector<32x128xf32>
    %10 = arith.mulf %9, %8 : vector<32x128xf32>
    %cst_7 = arith.constant 0.707106769 : f32
    %11 = vector.broadcast %cst_7 : f32 to vector<32x128xf32>
    %12 = arith.mulf %8, %11 : vector<32x128xf32>
    %13 = math.absf %12 : vector<32x128xf32>
    %cst_8 = arith.constant 0.327591091 : f32
    %14 = vector.broadcast %cst_8 : f32 to vector<32x128xf32>
    %15 = arith.mulf %14, %13 : vector<32x128xf32>
    %cst_9 = arith.constant 1.000000e+00 : f32
    %16 = vector.broadcast %cst_9 : f32 to vector<32x128xf32>
    %17 = arith.addf %16, %15 : vector<32x128xf32>
    %18 = tpu.reciprocal %17 {approx = true} : vector<32x128xf32> -> vector<32x128xf32>
    %cst_10 = arith.constant 1.06140542 : f32
    %19 = vector.broadcast %cst_10 : f32 to vector<32x128xf32>
    %20 = arith.mulf %18, %19 : vector<32x128xf32>
    %cst_11 = arith.constant -1.45315206 : f32
    %21 = vector.broadcast %cst_11 : f32 to vector<32x128xf32>
    %22 = arith.addf %21, %20 : vector<32x128xf32>
    %23 = arith.mulf %18, %22 : vector<32x128xf32>
    %cst_12 = arith.constant 1.42141378 : f32
    %24 = vector.broadcast %cst_12 : f32 to vector<32x128xf32>
    %25 = arith.addf %24, %23 : vector<32x128xf32>
    %26 = arith.mulf %18, %25 : vector<32x128xf32>
    %cst_13 = arith.constant -0.284496725 : f32
    %27 = vector.broadcast %cst_13 : f32 to vector<32x128xf32>
    %28 = arith.addf %27, %26 : vector<32x128xf32>
    %29 = arith.mulf %18, %28 : vector<32x128xf32>
    %cst_14 = arith.constant 0.254829586 : f32
    %30 = vector.broadcast %cst_14 : f32 to vector<32x128xf32>
    %31 = arith.addf %30, %29 : vector<32x128xf32>
    %32 = arith.mulf %18, %31 : vector<32x128xf32>
    %cst_15 = arith.constant 0.000000e+00 : f32
    %33 = vector.broadcast %cst_15 : f32 to vector<32x128xf32>
    %34 = arith.subf %33, %13 : vector<32x128xf32>
    %35 = arith.mulf %34, %13 : vector<32x128xf32>
    %36 = math.exp %35 : vector<32x128xf32>
    %37 = arith.mulf %32, %36 : vector<32x128xf32>
    %cst_16 = arith.constant 1.000000e+00 : f32
    %38 = vector.broadcast %cst_16 : f32 to vector<32x128xf32>
    %39 = arith.subf %38, %37 : vector<32x128xf32>
    %cst_17 = arith.constant 0.000000e+00 : f32
    %40 = vector.broadcast %cst_17 : f32 to vector<32x128xf32>
    %41 = arith.cmpf oge, %12, %40 : vector<32x128xf32>
    %cst_18 = arith.constant 0.000000e+00 : f32
    %42 = vector.broadcast %cst_18 : f32 to vector<32x128xf32>
    %43 = arith.subf %42, %39 : vector<32x128xf32>
    %44 = arith.select %41, %39, %43 : vector<32x128xi1>, vector<32x128xf32>
    %cst_19 = arith.constant 1.000000e+00 : f32
    %45 = vector.broadcast %cst_19 : f32 to vector<32x128xf32>
    %46 = arith.addf %45, %44 : vector<32x128xf32>
    %47 = arith.mulf %10, %46 : vector<32x128xf32>
    %c0_20 = arith.constant 0 : index
    %c0_21 = arith.constant 0 : index
    %48 = vector.load %arg8[%c0_20, %c0_21] : memref<32x128xf32, #tpu.memory_space<vmem>>, vector<32x128xf32>
    %49 = arith.truncf %47 : vector<32x128xf32> to vector<32x128xbf16>
    %c0_22 = arith.constant 0 : index
    %c0_23 = arith.constant 0 : index
    %50 = vector.load %arg5[%c0_22, %c0_23] : memref<128x128xbf16, #tpu.memory_space<vmem>>, vector<128x128xbf16>
    %cst_24 = arith.constant dense<0.000000e+00> : vector<32x128xf32>
    %51 = tpu.matmul %49, %50, %cst_24 {dimension_numbers = #tpu.dot_dimension_numbers<[1], [0], [0], [1], [0, 0, 1, 1], [], []>} : vector<32x128xbf16>, vector<128x128xbf16>, vector<32x128xf32> -> vector<32x128xf32>
    %52 = arith.addf %48, %51 : vector<32x128xf32>
    %c0_25 = arith.constant 0 : index
    %c0_26 = arith.constant 0 : index
    %53 = vector.load %arg8[%c0_25, %c0_26] : memref<32x128xf32, #tpu.memory_space<vmem>>, vector<32x128xf32>
    tpu.vector_store %arg8[%c0_25, %c0_26], %52 {strides = array<i32>} : memref<32x128xf32, #tpu.memory_space<vmem>>, vector<32x128xf32>,
    %c0_i32_27 = arith.constant 0 : i32
    %54 = arith.cmpi eq, %arg1, %c0_i32_27 : i32
    %55 = arith.extui %54 : i1 to i32
    %c0_i32_28 = arith.constant 0 : i32
    %56 = arith.cmpi ne, %55, %c0_i32_28 : i32
    scf.if %56 {
      %c0_29 = arith.constant 0 : index
      %c0_30 = arith.constant 0 : index
      %57 = vector.load %arg8[%c0_29, %c0_30] : memref<32x128xf32, #tpu.memory_space<vmem>>, vector<32x128xf32>
      %c0_31 = arith.constant 0 : index
      %c0_32 = arith.constant 0 : index
      %58 = vector.load %arg6[%c0_31, %c0_32] : memref<1x128xf32, #tpu.memory_space<vmem>>, vector<1x128xf32>
      %59 = vector.broadcast %58 : vector<1x128xf32> to vector<32x128xf32>
      %60 = arith.addf %57, %59 : vector<32x128xf32>
      %c0_33 = arith.constant 0 : index
      %c0_34 = arith.constant 0 : index
      %61 = vector.load %arg7[%c0_33, %c0_34] : memref<32x128xf32, #tpu.memory_space<vmem>>, vector<32x128xf32>
      tpu.vector_store %arg7[%c0_33, %c0_34], %60 {strides = array<i32>} : memref<32x128xf32, #tpu.memory_space<vmem>>, vector<32x128xf32>,
    } else {
    }
    return
  }
  func.func @transform_0(%arg0: i32, %arg1: i32) -> (i32, i32) {
    %c0_i32 = arith.constant 0 : i32
    %c0_i32_0 = arith.constant 0 : i32
    return %arg0, %c0_i32 : i32, i32
  }
  func.func @transform_1(%arg0: i32, %arg1: i32) -> (i32, i32) {
    %c0_i32 = arith.constant 0 : i32
    %c0_i32_0 = arith.constant 0 : i32
    return %c0_i32, %arg1 : i32, i32
  }
  func.func @transform_2(%arg0: i32, %arg1: i32) -> (i32, i32) {
    %c0_i32 = arith.constant 0 : i32
    %c0_i32_0 = arith.constant 0 : i32
    return %c0_i32, %arg1 : i32, i32
  }
  func.func @transform_3(%arg0: i32, %arg1: i32) -> (i32, i32) {
    %c0_i32 = arith.constant 0 : i32
    %c0_i32_0 = arith.constant 0 : i32
    return %arg1, %c0_i32 : i32, i32
  }
  func.func @transform_4(%arg0: i32, %arg1: i32) -> (i32, i32) {
    %c0_i32 = arith.constant 0 : i32
    %c0_i32_0 = arith.constant 0 : i32
    %c0_i32_1 = arith.constant 0 : i32
    return %c0_i32, %c0_i32_0 : i32, i32
  }
  func.func @transform_5(%arg0: i32, %arg1: i32) -> (i32, i32) {
    %c0_i32 = arith.constant 0 : i32
    %c0_i32_0 = arith.constant 0 : i32
    return %arg0, %c0_i32 : i32, i32
  }
}

module attributes {stable_mosaic.version = 11 : i64} {
  func.func @_ffn_kernel(%arg0: i32, %arg1: i32, %arg2: memref<32x32xbf16, #tpu.memory_space<vmem>>, %arg3: memref<32x128xbf16, #tpu.memory_space<vmem>>, %arg4: memref<1x128xf32, #tpu.memory_space<vmem>>, %arg5: memref<128x128xbf16, #tpu.memory_space<vmem>>, %arg6: memref<1x128xf32, #tpu.memory_space<vmem>>, %arg7: memref<32x128xf32, #tpu.memory_space<vmem>>, %arg8: memref<32x128xf32, #tpu.memory_space<vmem>>) attributes {dimension_semantics = [#tpu.dimension_semantics<parallel>, #tpu.dimension_semantics<arbitrary>], iteration_bounds = array<i64: 8, 1>, scalar_prefetch = 0 : i64, scratch_operands = 1 : i64, tpu.core_type = #tpu.core_type<tc>, window_params = [{transform_indices = @transform_0, window_bounds = array<i64: 32, 32>}, {transform_indices = @transform_1, window_bounds = array<i64: 32, 128>}, {transform_indices = @transform_2, window_bounds = array<i64: 1, 128>}, {transform_indices = @transform_3, window_bounds = array<i64: 128, 128>}, {pipeline_mode = #tpu.pipeline_mode<synchronous>, transform_indices = @transform_4, window_bounds = array<i64: 1, 128>}, {transform_indices = @transform_5, window_bounds = array<i64: 32, 128>}]} {
    %c0_i32 = arith.constant 0 : i32
    %0 = arith.cmpi eq, %arg1, %c0_i32 : i32
    %1 = arith.extui %0 : i1 to i32
    %c0_i32_0 = arith.constant 0 : i32
    %2 = arith.cmpi ne, %1, %c0_i32_0 : i32
    scf.if %2 {
      %cst_29 = arith.constant 0.000000e+00 : f32
      %57 = vector.broadcast %cst_29 : f32 to vector<32x128xf32>
      %c0_30 = arith.constant 0 : index
      %c0_31 = arith.constant 0 : index
      %58 = vector.load %arg8[%c0_30, %c0_31] : memref<32x128xf32, #tpu.memory_space<vmem>>, vector<32x128xf32>
      tpu.vector_store %arg8[%c0_30, %c0_31], %57 {strides = array<i32>} : memref<32x128xf32, #tpu.memory_space<vmem>>, vector<32x128xf32>,
    } else {
    }
    %c0 = arith.constant 0 : index
    %c0_1 = arith.constant 0 : index
    %3 = vector.load %arg2[%c0, %c0_1] : memref<32x32xbf16, #tpu.memory_space<vmem>>, vector<32x32xbf16>
    %c0_2 = arith.constant 0 : index
    %c0_3 = arith.constant 0 : index
    %4 = vector.load %arg3[%c0_2, %c0_3] : memref<32x128xbf16, #tpu.memory_space<vmem>>, vector<32x128xbf16>
    %cst = arith.constant dense<0.000000e+00> : vector<32x128xf32>
    %5 = tpu.matmul %3, %4, %cst {dimension_numbers = #tpu.dot_dimension_numbers<[1], [0], [0], [1], [0, 0, 1, 1], [], []>} : vector<32x32xbf16>, vector<32x128xbf16>, vector<32x128xf32> -> vector<32x128xf32>
    %c0_4 = arith.constant 0 : index
    %c0_5 = arith.constant 0 : index
    %6 = vector.load %arg4[%c0_4, %c0_5] : memref<1x128xf32, #tpu.memory_space<vmem>>, vector<1x128xf32>
    %7 = vector.broadcast %6 : vector<1x128xf32> to vector<32x128xf32>
    %8 = arith.addf %5, %7 : vector<32x128xf32>
    %cst_6 = arith.constant 5.000000e-01 : f32
    %9 = vector.broadcast %cst_6 : f32 to vector<32x128xf32>
    %10 = arith.mulf %9, %8 : vector<32x128xf32>
    %cst_7 = arith.constant 0.707106769 : f32
    %11 = vector.broadcast %cst_7 : f32 to vector<32x128xf32>
    %12 = arith.mulf %8, %11 : vector<32x128xf32>
    %13 = math.absf %12 : vector<32x128xf32>
    %cst_8 = arith.constant 0.327591091 : f32
    %14 = vector.broadcast %cst_8 : f32 to vector<32x128xf32>
    %15 = arith.mulf %14, %13 : vector<32x128xf32>
    %cst_9 = arith.constant 1.000000e+00 : f32
    %16 = vector.broadcast %cst_9 : f32 to vector<32x128xf32>
    %17 = arith.addf %16, %15 : vector<32x128xf32>
    %18 = tpu.reciprocal %17 {approx = true} : vector<32x128xf32> -> vector<32x128xf32>
    %cst_10 = arith.constant 1.06140542 : f32
    %19 = vector.broadcast %cst_10 : f32 to vector<32x128xf32>
    %20 = arith.mulf %18, %19 : vector<32x128xf32>
    %cst_11 = arith.constant -1.45315206 : f32
    %21 = vector.broadcast %cst_11 : f32 to vector<32x128xf32>
    %22 = arith.addf %21, %20 : vector<32x128xf32>
    %23 = arith.mulf %18, %22 : vector<32x128xf32>
    %cst_12 = arith.constant 1.42141378 : f32
    %24 = vector.broadcast %cst_12 : f32 to vector<32x128xf32>
    %25 = arith.addf %24, %23 : vector<32x128xf32>
    %26 = arith.mulf %18, %25 : vector<32x128xf32>
    %cst_13 = arith.constant -0.284496725 : f32
    %27 = vector.broadcast %cst_13 : f32 to vector<32x128xf32>
    %28 = arith.addf %27, %26 : vector<32x128xf32>
    %29 = arith.mulf %18, %28 : vector<32x128xf32>
    %cst_14 = arith.constant 0.254829586 : f32
    %30 = vector.broadcast %cst_14 : f32 to vector<32x128xf32>
    %31 = arith.addf %30, %29 : vector<32x128xf32>
    %32 = arith.mulf %18, %31 : vector<32x128xf32>
    %cst_15 = arith.constant 0.000000e+00 : f32
    %33 = vector.broadcast %cst_15 : f32 to vector<32x128xf32>
    %34 = arith.subf %33, %13 : vector<32x128xf32>
    %35 = arith.mulf %34, %13 : vector<32x128xf32>
    %36 = math.exp %35 : vector<32x128xf32>
    %37 = arith.mulf %32, %36 : vector<32x128xf32>
    %cst_16 = arith.constant 1.000000e+00 : f32
    %38 = vector.broadcast %cst_16 : f32 to vector<32x128xf32>
    %39 = arith.subf %38, %37 : vector<32x128xf32>
    %cst_17 = arith.constant 0.000000e+00 : f32
    %40 = vector.broadcast %cst_17 : f32 to vector<32x128xf32>
    %41 = arith.cmpf oge, %12, %40 : vector<32x128xf32>
    %cst_18 = arith.constant 0.000000e+00 : f32
    %42 = vector.broadcast %cst_18 : f32 to vector<32x128xf32>
    %43 = arith.subf %42, %39 : vector<32x128xf32>
    %44 = arith.select %41, %39, %43 : vector<32x128xi1>, vector<32x128xf32>
    %cst_19 = arith.constant 1.000000e+00 : f32
    %45 = vector.broadcast %cst_19 : f32 to vector<32x128xf32>
    %46 = arith.addf %45, %44 : vector<32x128xf32>
    %47 = arith.mulf %10, %46 : vector<32x128xf32>
    %c0_20 = arith.constant 0 : index
    %c0_21 = arith.constant 0 : index
    %48 = vector.load %arg8[%c0_20, %c0_21] : memref<32x128xf32, #tpu.memory_space<vmem>>, vector<32x128xf32>
    %49 = arith.truncf %47 : vector<32x128xf32> to vector<32x128xbf16>
    %c0_22 = arith.constant 0 : index
    %c0_23 = arith.constant 0 : index
    %50 = vector.load %arg5[%c0_22, %c0_23] : memref<128x128xbf16, #tpu.memory_space<vmem>>, vector<128x128xbf16>
    %cst_24 = arith.constant dense<0.000000e+00> : vector<32x128xf32>
    %51 = tpu.matmul %49, %50, %cst_24 {dimension_numbers = #tpu.dot_dimension_numbers<[1], [0], [0], [1], [0, 0, 1, 1], [], []>} : vector<32x128xbf16>, vector<128x128xbf16>, vector<32x128xf32> -> vector<32x128xf32>
    %52 = arith.addf %48, %51 : vector<32x128xf32>
    %c0_25 = arith.constant 0 : index
    %c0_26 = arith.constant 0 : index
    %53 = vector.load %arg8[%c0_25, %c0_26] : memref<32x128xf32, #tpu.memory_space<vmem>>, vector<32x128xf32>
    tpu.vector_store %arg8[%c0_25, %c0_26], %52 {strides = array<i32>} : memref<32x128xf32, #tpu.memory_space<vmem>>, vector<32x128xf32>,
    %c0_i32_27 = arith.constant 0 : i32
    %54 = arith.cmpi eq, %arg1, %c0_i32_27 : i32
    %55 = arith.extui %54 : i1 to i32
    %c0_i32_28 = arith.constant 0 : i32
    %56 = arith.cmpi ne, %55, %c0_i32_28 : i32
    scf.if %56 {
      %c0_29 = arith.constant 0 : index
      %c0_30 = arith.constant 0 : index
      %57 = vector.load %arg8[%c0_29, %c0_30] : memref<32x128xf32, #tpu.memory_space<vmem>>, vector<32x128xf32>
      %c0_31 = arith.constant 0 : index
      %c0_32 = arith.constant 0 : index
      %58 = vector.load %arg6[%c0_31, %c0_32] : memref<1x128xf32, #tpu.memory_space<vmem>>, vector<1x128xf32>
      %59 = vector.broadcast %58 : vector<1x128xf32> to vector<32x128xf32>
      %60 = arith.addf %57, %59 : vector<32x128xf32>
      %c0_33 = arith.constant 0 : index
      %c0_34 = arith.constant 0 : index
      %61 = vector.load %arg7[%c0_33, %c0_34] : memref<32x128xf32, #tpu.memory_space<vmem>>, vector<32x128xf32>
      tpu.vector_store %arg7[%c0_33, %c0_34], %60 {strides = array<i32>} : memref<32x128xf32, #tpu.memory_space<vmem>>, vector<32x128xf32>,
    } else {
    }
    return
  }
  func.func @transform_0(%arg0: i32, %arg1: i32) -> (i32, i32) {
    %c0_i32 = arith.constant 0 : i32
    %c0_i32_0 = arith.constant 0 : i32
    return %arg0, %c0_i32 : i32, i32
  }
  func.func @transform_1(%arg0: i32, %arg1: i32) -> (i32, i32) {
    %c0_i32 = arith.constant 0 : i32
    %c0_i32_0 = arith.constant 0 : i32
    return %c0_i32, %arg1 : i32, i32
  }
  func.func @transform_2(%arg0: i32, %arg1: i32) -> (i32, i32) {
    %c0_i32 = arith.constant 0 : i32
    %c0_i32_0 = arith.constant 0 : i32
    return %c0_i32, %arg1 : i32, i32
  }
  func.func @transform_3(%arg0: i32, %arg1: i32) -> (i32, i32) {
    %c0_i32 = arith.constant 0 : i32
    %c0_i32_0 = arith.constant 0 : i32
    return %arg1, %c0_i32 : i32, i32
  }
  func.func @transform_4(%arg0: i32, %arg1: i32) -> (i32, i32) {
    %c0_i32 = arith.constant 0 : i32
    %c0_i32_0 = arith.constant 0 : i32
    %c0_i32_1 = arith.constant 0 : i32
    return %c0_i32, %c0_i32_0 : i32, i32
  }
  func.func @transform_5(%arg0: i32, %arg1: i32) -> (i32, i32) {
    %c0_i32 = arith.constant 0 : i32
    %c0_i32_0 = arith.constant 0 : i32
    return %arg0, %c0_i32 : i32, i32
  }
}

</mosaic_0001>

<bundles_post_ra>
// kernel: _lambda_.1
= control target key start
LH: loop header
LB: loop body
LE: loop exit
PB: predicated region body
PF: predicated region fallthrough
CT: control target
= control target key end

     0   :  { %10 = vsyncpa [#allocation4], 0  ;;  %s1227_s0 = inlined_call_operand.vmem [shape: bf16[256,32], index: 0, kind: input, shape index: {}]   ;;  %s1228_s1 = inlined_call_operand.vmem [shape: bf16[32,128], index: 1, kind: input, shape index: {}]   ;;  %s1229_s2 = inlined_call_operand.vmem [shape: f32[1,128], index: 2, kind: input, shape index: {}]   ;;  %s1230_s3 = inlined_call_operand.vmem [shape: bf16[128,128], index: 3, kind: input, shape index: {}]   ;;  %s1231_s4 = inlined_call_operand.vmem [shape: f32[1,128], index: 4, kind: input, shape index: {}]   ;;  %s1232_s5 = inlined_call_operand.hbm [shape: f32[256,128], index: 5, kind: output, shape index: {}]  }
   0x1   :  { %12 = vsyncpa [#allocation4 + $0x1], 0  ;;  %s1045_s18 = smov 0   ;;  %s1047_s19 = smov 0  }
   0x2   :  { %s1049_s20 = smov 0   ;;  %s1051_s21 = smov 0  }
   0x3   :  { %s1053_s22 = smov 0   ;;  %s1055_s23 = smov 0  }
   0x4 LB: > { %s772_s24 = sadd.s32 4294967295, %s1010_s23   ;;  %s773_s25 = sadd.s32 4294967294, %s1010_s23   ;;  %s1010_s23 = sphi %s1055_s23, %s18_s23   ;;  %s1006_s22 = sphi %s1053_s22, %s1239_s22   ;;  %s1002_s21 = sphi %s1051_s21, %s1238_s21   ;;  %s998_s20 = sphi %s1049_s20, %s1237_s20   ;;  %s994_s19 = sphi %s1047_s19, %s1236_s19   ;;  %s990_s18 = sphi %s1045_s18, %s1235_s18  }
   0x5   : > { %s30_s26 = sadd.s32 1, %s1006_s22  ;;  %s162_s27 = sadd.s32 1, %s998_s20 }
   0x6   : > { %p32_p0 = scmp.ge.s32.totalorder %s30_s26, 8  ;;  %p172_p1 = scmp.ne.s32.totalorder %s998_s20, %s994_s19 }
   0x7   : > { %p173_p2 = scmp.eq.s32.totalorder %s772_s24, 7  ;;  %p178_p3 = scmp.ne.s32.totalorder %s994_s19, %s990_s18 }
   0x8   : > { %s1241_s26 = smov (%p32_p0, %s30_s26), 0  ;;  %p179_p5 = scmp.eq.s32.totalorder %s773_s25, 7 }
   0x9   : > { %p1085_p4 = por %p173_p2, %p172_p1  ;;  %s159_s29 = ssub.s32 %s1006_s22, %s1241_s26 }
   0xa   : > { %p779_p6 = scmp.ge.s32.totalorder %s1010_s23, 1  ;;  %p160_p7 = scmp.eq.s32.totalorder %s159_s29, 0 }
   0xb   : > { %p1092_p8 = por %p179_p5, %p178_p3  ;;  %p231_p9 = scmp.lt.s32.totalorder %s1010_s23, 9 }
   0xc   : > { %s1098_s6 = scalar_select %p160_p7, %s998_s20, %s162_s27  }
   0xd   : > { %p232_p10 = pnand %p779_p6, %p231_p9 }
   0xe   : > { %v904_v0 = vld [vmem:[%s1228_s1] sm:$0xff] (!%p232_p10)   ;;  %s781_s9 = sshll.u32 (!%p232_p10), %s1002_s21, 2  ;;  %v905_v1 = vld [vmem:[%s1228_s1 + $0x8] sm:$0xff] (!%p232_p10)   ;;  %vm337_vm0 = vcmask (!%p232_p10), 261120   ;;  %v910_v6 = vld [vmem:[%s1230_s3 + $0x10] sm:$0xff] (!%p232_p10)   ;;  %s268_s25 = sand.u32 (!%p232_p10), 1, %s994_s19  }
   0xf   : > { %235 = sbr.rel (%p232_p10) target bundleno = 527 (0x20f), region = 40  ;;  %p272_p11 = scmp.lt.s32.totalorder (!%p232_p10), %s781_s9, 31  ;;  %819 = vmatprep.subr.bf16.mxu0 (!%p232_p10), %v904_v0  ;;  %v908_v4 = vld [vmem:[%s1230_s3] sm:$0xff] (!%p232_p10)   ;;  %v909_v5 = vld [vmem:[%s1230_s3 + $0x8] sm:$0xff] (!%p232_p10)   ;;  %v911_v7 = vld [vmem:[%s1230_s3 + $0x18] sm:$0xff] (!%p232_p10)  }
  0x10   : > { %820 = vmatpush3.bf16.msra.mxu0 (!%p232_p10), %v904_v0  ;;  %827 = vmatprep.subr.bf16.mxu1 (!%p232_p10), %v908_v4  ;;  %v912_v8 = vld [vmem:[%s1230_s3 + $0x20] sm:$0xff] (!%p232_p10)   ;;  %v913_v9 = vld [vmem:[%s1230_s3 + $0x28] sm:$0xff] (!%p232_p10)   ;;  %v914_v10 = vld [vmem:[%s1230_s3 + $0x30] sm:$0xff] (!%p232_p10)   ;;  %s780_s27 = sshll.u32 (!%p232_p10), %s268_s25, 5  ;;  %s804_s10 = sshll.u32 (!%p232_p10), %s1002_s21, 9 }
  0x11   : > { %821 = vmatprep.subr.bf16.mxu0 (!%p232_p10), %v905_v1  ;;  %828 = vmatpush3.bf16.msra.mxu1 (!%p232_p10), %v908_v4  ;;  %v915_v11 = vld [vmem:[%s1230_s3 + $0x38] sm:$0xff] (!%p232_p10)   ;;  %v783_v12 = vld [vmem:[%s1229_s2] ss:$0 sm:$0xff] (!%p232_p10)  ;;  %s270_s8 = scalar_lea.vmem (!%p232_p10), [#allocation3], %s780_s27  ;;  %s1179_s13 = scalar_lea.hbm (!%p232_p10), %s1232_s5, %s804_s10 }
  0x12   : > { %829 = vmatprep.subr.bf16.mxu1 (!%p232_p10), %v909_v5  ;;  %s1181_s21 = scalar_lea.sflag (!%p232_p10), [#allocation4], %s268_s25 }
  0x14   : > { %822 = vmatpush3.bf16.msra.mxu0 (!%p232_p10), %v905_v1 }
  0x15   : > { %830 = vmatpush3.bf16.msra.mxu1 (!%p232_p10), %v909_v5 }
  0x16   : > { %s1243_s9 = smov (!%p272_p11, %s781_s9), 31  ;;  %831 = vmatprep.subr.bf16.mxu1 %v910_v6 }
  0x17   : > { %s782_s12 = sshll.u32 %s1243_s9, 2  ;;  %s660_s9 = sshll.u32 %s270_s8, 4  ;;  %s1174_s9 = int_to_ptr.vmem [resolvable:$true] %s660_s9 }
  0x18   : > { %s275_s15 = scalar_lea.vmem %s1227_s0, %s782_s12  ;;  %s932_s14 = scalar_lea.vmem %s1174_s9, 512 }
  0x19   : > { %v906_v2 = vld [vmem:[%s275_s15] sm:$0xff]   ;;  %v907_v3 = vld [vmem:[%s275_s15 + $0x8] sm:$0xff]   ;;  %832 = vmatpush3.bf16.msra.mxu1 %v910_v6  ;;  %p933_p12 = scmp.ne.s32.totalorder %s1174_s9, %s932_s14  ;;  %s1012_s15 = smov [#allocation3]  }
  0x1a   : > { %823 = vmatprep.mubr.msk.bf16.mxu0 %vm337_vm0, %v906_v2  ;;  %833 = vmatprep.subr.bf16.mxu1 %v911_v7  ;;  %s936_s16 = sshll.u32 %s1012_s15, 4  ;;  %s937_s16 = int_to_ptr.vmem [resolvable:$false] %s936_s16 }
  0x1b   : > { %824 = vmatmul.mubr.msk.bf16.vlgmr.msra.gmra.mrb[0].mxu0 %vm337_vm0, %v907_v3  ;;  %p934_p13 = pnand %p933_p12, %p1085_p4  ;;  %s938_s17 = scalar_lea.vmem %s937_s16, 1024 }
  0x1c   : > { %p939_p1 = scmp.lt.s32.totalorder %s1174_s9, %s937_s16  ;;  %p940_p2 = scmp.lt.s32.totalorder %s938_s17, %s932_s14 }
  0x1d   : > { %834 = vmatpush3.bf16.msra.mxu1 %v911_v7  ;;  %p935_p0 = pneg %p934_p13 }
  0x1e   : > { %835 = vmatprep.subr.bf16.mxu1 %v912_v8  ;;  %p941_p3 = por %p940_p2, %p939_p1 }
  0x20   : > { %p942_p5 = pnand %p941_p3, %p935_p0 }
  0x21   : > { %836 = vmatpush3.bf16.msra.mxu1 %v912_v8 }
  0x22   : > { %837 = vmatprep.subr.bf16.mxu1 %v913_v9 }
  0x25   : > { %838 = vmatpush3.bf16.msra.mxu1 %v913_v9 }
  0x26   : > { %839 = vmatprep.subr.bf16.mxu1 %v914_v10 }
  0x29   : > { %840 = vmatpush3.bf16.msra.mxu1 %v914_v10 }
  0x2a   : > { %841 = vmatprep.subr.bf16.mxu1 %v915_v11 }
  0x2d   : > { %842 = vmatpush3.bf16.msra.mxu1 %v915_v11 }
  0xee   : > { %v825_v13 = vpop.f32.mrb[0].mxu0 }
  0xef   : > { %v1137_v14 = vadd.f32 %v825_v13, %v783_v12  ;;  %v378_v15 = vpop.f32.mrb[1].mxu0 }
  0xf0   : > { %v1139_v16 = vadd.f32 %v783_v12, %v378_v15  ;;  %v826_v17 = vpop.f32.mrb[2].mxu0 }
  0xf1   : > { %v1142_v18 = vmul.f32 0.70710677, %v1137_v14  ;;  %v1144_v19 = vadd.f32 %v826_v17, %v783_v12  ;;  %v381_v20 = vpop.f32.mrb[3].mxu0 }
  0xf2   : > { %v1147_v21 = vmul.f32 0.70710677, %v1139_v16  ;;  %v1149_v22 = vadd.f32 %v783_v12, %v381_v20 }
  0xf3   : > { %v403_v23 = vand.u32 2147483647, %v1142_v18  ;;  %v1153_v24 = vmul.f32 0.70710677, %v1144_v19  ;;  %vm479_vm1 = vcmp.ge.f32.partialorder %v1142_v18, 0.0 }
  0xf4   : > { %v401_v25 = vand.u32 2147483647, %v1147_v21  ;;  %v1157_v26 = vmul.f32 0.70710677, %v1149_v22  ;;  %vm477_vm2 = vcmp.ge.f32.partialorder %v1147_v21, 0.0 }
  0xf5   : > { %v407_v27 = vmul.f32 0.3275911, %v403_v23  ;;  %v404_v28 = vand.u32 2147483647, %v1153_v24  ;;  %v455_v37 = vsub.f32 0.0, %v403_v23  ;;  %vm480_vm3 = vcmp.ge.f32.partialorder %v1153_v24, 0.0 }
  0xf6   : > { %v405_v29 = vmul.f32 0.3275911, %v401_v25  ;;  %v402_v30 = vand.u32 2147483647, %v1157_v26  ;;  %v453_v38 = vsub.f32 0.0, %v401_v25  ;;  %vm478_vm4 = vcmp.ge.f32.partialorder %v1157_v26, 0.0 }
  0xf7   : > { %v411_v31 = vadd.f32 1.0, %v407_v27  ;;  %v408_v32 = vmul.f32 0.3275911, %v404_v28  ;;  %v459_v40 = vmul.f32 %v455_v37, %v403_v23  ;;  %v456_v41 = vsub.f32 0.0, %v404_v28 }
  0xf8   : > { %v409_v33 = vadd.f32 1.0, %v405_v29  ;;  %v406_v34 = vmul.f32 0.3275911, %v402_v30  ;;  %v457_v44 = vmul.f32 %v453_v38, %v401_v25  ;;  %v454_v45 = vsub.f32 0.0, %v402_v30 }
  0xf9   : > { %916 = vrcp.f32 %v411_v31  ;;  %v412_v35 = vadd.f32 1.0, %v408_v32  ;;  %v465_v49 = vmul.f32 1.442695, %v459_v40  ;;  %v460_v50 = vmul.f32 %v456_v41, %v404_v28 }
  0xfa   : > { %918 = vrcp.f32 %v409_v33  ;;  %v410_v36 = vadd.f32 1.0, %v406_v34  ;;  %v461_v53 = vmul.f32 1.442695, %v457_v44  ;;  %v458_v56 = vmul.f32 %v454_v45, %v402_v30 }
  0xfb   : > { %920 = vrcp.f32 %v412_v35  ;;  %v467_v61 = vmul.f32 1.442695, %v460_v50 }
  0xfc   : > { %922 = vrcp.f32 %v410_v36  ;;  %v463_v2 = vmul.f32 1.442695, %v458_v56  ;;  %v393_v56 = vmul.f32 0.5, %v1139_v16 }
  0xfd   : > { %924 = vpow2.f32 %v465_v49 }
  0xfe   : > { %926 = vpow2.f32 %v461_v53 }
  0xff   : > { %928 = vpow2.f32 %v467_v61 }
 0x100   : > { %930 = vpow2.f32 %v463_v2 }
 0x103   : > { %v917_v39 = vpop.eup %916 }
 0x104   : > { %v919_v42 = vpop.eup %918  ;;  %v419_v43 = vmul.f32 1.0614054, %v917_v39 }
 0x105   : > { %v417_v46 = vmul.f32 1.0614054, %v919_v42  ;;  %v921_v48 = vpop.eup %920 }
 0x106   : > { %v423_v47 = vadd.f32 -1.4531521, %v419_v43  ;;  %v420_v54 = vmul.f32 1.0614054, %v921_v48  ;;  %v923_v55 = vpop.eup %922 }
 0x107   : > { %v421_v51 = vadd.f32 -1.4531521, %v417_v46  ;;  %v418_v60 = vmul.f32 1.0614054, %v923_v55  ;;  %v925_v27 = vpop.eup %924 }
 0x108   : > { %v427_v52 = vmul.f32 %v917_v39, %v423_v47  ;;  %v424_v59 = vadd.f32 -1.4531521, %v420_v54  ;;  %v927_v29 = vpop.eup %926  ;;  %v396_v54 = vmul.f32 0.5, %v1144_v19  ;;  %v798_v19 = vld [vmem:[%s1231_s4] ss:$0 sm:$0xff] }
 0x109   : > { %v425_v57 = vmul.f32 %v919_v42, %v421_v51  ;;  %v422_v1 = vadd.f32 -1.4531521, %v418_v60  ;;  %v929_v37 = vpop.eup %928 }
 0x10a   : > { %v431_v58 = vadd.f32 1.4214138, %v427_v52  ;;  %v428_v0 = vmul.f32 %v921_v48, %v424_v59  ;;  %v931_v44 = vpop.eup %930  ;;  %v394_v59 = vmul.f32 0.5, %v1149_v22 }
 0x10b   : > { %v429_v62 = vadd.f32 1.4214138, %v425_v57  ;;  %v426_v6 = vmul.f32 %v923_v55, %v422_v1 }
 0x10c   : > { %v435_v63 = vmul.f32 %v917_v39, %v431_v58  ;;  %v432_v5 = vadd.f32 1.4214138, %v428_v0 }
 0x10d   : > { %v433_v3 = vmul.f32 %v919_v42, %v429_v62  ;;  %v430_v10 = vadd.f32 1.4214138, %v426_v6 }
 0x10e   : > { %v439_v4 = vadd.f32 -0.28449672, %v435_v63  ;;  %v436_v9 = vmul.f32 %v921_v48, %v432_v5 }
 0x10f   : > { %v437_v7 = vadd.f32 -0.28449672, %v433_v3  ;;  %v434_v15 = vmul.f32 %v923_v55, %v430_v10 }
 0x110   : > { %v443_v8 = vmul.f32 %v917_v39, %v439_v4  ;;  %v440_v13 = vadd.f32 -0.28449672, %v436_v9 }
 0x111   : > { %v441_v11 = vmul.f32 %v919_v42, %v437_v7  ;;  %v438_v25 = vadd.f32 -0.28449672, %v434_v15 }
 0x112   : > { %v447_v12 = vadd.f32 0.2548296, %v443_v8  ;;  %v444_v23 = vmul.f32 %v921_v48, %v440_v13 }
 0x113   : > { %v445_v17 = vadd.f32 0.2548296, %v441_v11  ;;  %v442_v32 = vmul.f32 %v923_v55, %v438_v25 }
 0x114   : > { %v451_v20 = vmul.f32 %v917_v39, %v447_v12  ;;  %v448_v31 = vadd.f32 0.2548296, %v444_v23 }
 0x115   : > { %v449_v28 = vmul.f32 %v919_v42, %v445_v17  ;;  %v446_v36 = vadd.f32 0.2548296, %v442_v32 }
 0x116   : > { %v471_v30 = vmul.f32 %v925_v27, %v451_v20  ;;  %v452_v35 = vmul.f32 %v921_v48, %v448_v31  ;;  %v395_v48 = vmul.f32 0.5, %v1137_v14 }
 0x117   : > { %v469_v33 = vmul.f32 %v927_v29, %v449_v28  ;;  %v450_v43 = vmul.f32 %v923_v55, %v446_v36 }
 0x118   : > { %v475_v34 = vsub.f32 1.0, %v471_v30  ;;  %v472_v41 = vmul.f32 %v929_v37, %v452_v35 }
 0x119   : > { %v473_v38 = vsub.f32 1.0, %v469_v33  ;;  %v470_v42 = vmul.f32 %v931_v44, %v450_v43 }
 0x11a   : > { %v483_v40 = vsub.f32 0.0, %v475_v34  ;;  %v476_v46 = vsub.f32 1.0, %v472_v41 }
 0x11b   : > { %v481_v39 = vsub.f32 0.0, %v473_v38  ;;  %v474_v49 = vsub.f32 1.0, %v470_v42 }
 0x11c   : > { %v487_v45 = vsel %vm479_vm1, %v475_v34, %v483_v40  ;;  %v484_v47 = vsub.f32 0.0, %v476_v46 }
 0x11d   : > { %v485_v50 = vsel %vm477_vm2, %v473_v38, %v481_v39  ;;  %v491_v51 = vadd.f32 1.0, %v487_v45  ;;  %v482_v53 = vsub.f32 0.0, %v474_v49 }
 0x11e   : > { %v488_v52 = vsel %vm480_vm3, %v476_v46, %v484_v47  ;;  %v489_v55 = vadd.f32 1.0, %v485_v50 }
 0x11f   : > { %v492_v18 = vadd.f32 1.0, %v488_v52  ;;  %v486_v21 = vsel %vm478_vm4, %v474_v49, %v482_v53  ;;  %v495_v57 = vmul.f32 %v491_v51, %v395_v48 }
 0x120   : > { %v490_v24 = vadd.f32 1.0, %v486_v21  ;;  %v493_v60 = vmul.f32 %v489_v55, %v393_v56 }
 0x121   : > { %v496_v58 = vmul.f32 %v492_v18, %v396_v54 }
 0x122   : > { %v494_v14 = vmul.f32 %v490_v24, %v394_v59 }
 0x123   : > { %v502_v61 = vpack.c.bf16 %v496_v58, %v495_v57 }
 0x124   : > { %v501_v62 = vpack.c.bf16 %v494_v14, %v493_v60 }
 0x126   : > { %843 = vmatprep.mubr.bf16.mxu1 %v501_v62 }
 0x127   : > { %844 = vmatmul.mubr.bf16.vlgmr.msra.gmra.mrb[0].mxu1 %v502_v61 }
 0x1fa   : > { %v845_v16 = vpop.f32.mrb[0].mxu1 }
 0x1fb   : > { %v640_v26 = vadd.f32 %v845_v16, %v798_v19  ;;  %v601_v22 = vpop.f32.mrb[1].mxu1 }
 0x1fc   : > { %v638_v63 = vadd.f32 %v798_v19, %v601_v22  ;;  %v846_v0 = vpop.f32.mrb[2].mxu1 }
 0x1fd   : > { %644 = vst [vmem:[%s270_s8 + $0x10] sm:$0xff] %v640_v26  ;;  %v641_v1 = vadd.f32 %v846_v0, %v798_v19  ;;  %v604_v2 = vpop.f32.mrb[3].mxu1 }
 0x1fe   : > { %642 = vst [vmem:[%s270_s8] sm:$0xff] %v638_v63  ;;  %v639_v3 = vadd.f32 %v798_v19, %v604_v2 }
 0x1ff   : > { %645 = vst [vmem:[%s270_s8 + $0x18] sm:$0xff] %v641_v1 }
 0x200   : > { %643 = vst [vmem:[%s270_s8 + $0x8] sm:$0xff] %v639_v3 }
 0x201   : > { %945 = shalt.err (!%p942_p5)
}
 0x202   : > { %s946_s24 = scalar_lea.hbm %s1179_s13, 512  ;;  %s950_s29 = scalar_lea.hbm %s1232_s5, 4096 }
 0x203   : > { %p947_p6 = scmp.ne.s32.totalorder %s1179_s13, %s946_s24  ;;  %p951_p10 = scmp.lt.u32.totalorder %s1179_s13, %s1232_s5 }
 0x204   : > { %p952_p11 = scmp.lt.u32.totalorder %s950_s29, %s946_s24  ;;  %p954_p13 = scmp.lt.u32.totalorder %s946_s24, %s1179_s13 }
 0x205   : > { %p948_p7 = pnand %p947_p6, %p1085_p4 }
 0x206   : > { %p953_p12 = por %p952_p11, %p951_p10 }
 0x207   : > { %p949_p9 = pneg %p948_p7 }
 0x208   : > { %p955_p0 = por %p954_p13, %p953_p12 }
 0x20a   : > { %p956_p1 = pnand %p955_p0, %p949_p9 }
 0x20c   : > { %959 = shalt.err (!%p956_p1)
}
 0x20d   : > { %s1013_s10 = smov 128   ;;  %s1014_s11 = smov 8  }
 0x20e   : > { %847 = dma.vmem_to_hbm [thread:$0]  (%p1085_p4), %s1174_s9, 512, %s1179_s13, %s1181_s21, %s1013_s10, %s1013_s10, %s1014_s11  }
 0x20f PF: > { %p853_p2 = scmp.ge.s32.totalorder %s1010_s23, 2  ;;  %s675_s12 = sand.u32 1, %s990_s18  }
 0x210   : > { %s676_s14 = scalar_lea.sflag [#allocation4], %s675_s12 }
 0x211   : > { %p850_p3 = pnand %p853_p2, %p1092_p8 }
 0x213   : > { %985 = dma.done.wait (!%p850_p3), %s676_s14, 512  }
 0x214   : > { %987 = vsyncadd (!%p850_p3), %s676_s14, 4294966784  ;;  %s18_s23 = sadd.s32 1, %s1010_s23   ;;  %s1235_s18 = smov %s994_s19 }
 0x215   : > { %p15_p5 = scmp.ge.s32.totalorder %s18_s23, 10   ;;  %s1236_s19 = smov %s998_s20 }
 0x216   : > { %s1237_s20 = smov %s1098_s6  ;;  %s1238_s21 = smov %s1006_s22 }
 0x217   : > { %s1239_s22 = smov %s1241_s26  ;;  %17 = sbr.rel (!%p15_p5) target bundleno = 4 (0x4), region = 92 }
 0x21e   :  { %681 = vsyncpa [#allocation4], 1 }
 0x21f   :  { %683 = vsyncpa [#allocation4 + $0x1], 1 }

// kernel: _lambda_.1
= control target key start
LH: loop header
LB: loop body
LE: loop exit
PB: predicated region body
PF: predicated region fallthrough
CT: control target
= control target key end

     0   :  { %10 = vsyncpa [#allocation4], 0  ;;  %s1227_s0 = inlined_call_operand.vmem [shape: bf16[256,32], index: 0, kind: input, shape index: {}]   ;;  %s1228_s1 = inlined_call_operand.vmem [shape: bf16[32,128], index: 1, kind: input, shape index: {}]   ;;  %s1229_s2 = inlined_call_operand.vmem [shape: f32[1,128], index: 2, kind: input, shape index: {}]   ;;  %s1230_s3 = inlined_call_operand.vmem [shape: bf16[128,128], index: 3, kind: input, shape index: {}]   ;;  %s1231_s4 = inlined_call_operand.vmem [shape: f32[1,128], index: 4, kind: input, shape index: {}]   ;;  %s1232_s5 = inlined_call_operand.hbm [shape: f32[256,128], index: 5, kind: output, shape index: {}]  }
   0x1   :  { %12 = vsyncpa [#allocation4 + $0x1], 0  ;;  %s1045_s18 = smov 0   ;;  %s1047_s19 = smov 0  }
   0x2   :  { %s1049_s20 = smov 0   ;;  %s1051_s21 = smov 0  }
   0x3   :  { %s1053_s22 = smov 0   ;;  %s1055_s23 = smov 0  }
   0x4 LB: > { %s772_s24 = sadd.s32 4294967295, %s1010_s23   ;;  %s773_s25 = sadd.s32 4294967294, %s1010_s23   ;;  %s1010_s23 = sphi %s1055_s23, %s18_s23   ;;  %s1006_s22 = sphi %s1053_s22, %s1239_s22   ;;  %s1002_s21 = sphi %s1051_s21, %s1238_s21   ;;  %s998_s20 = sphi %s1049_s20, %s1237_s20   ;;  %s994_s19 = sphi %s1047_s19, %s1236_s19   ;;  %s990_s18 = sphi %s1045_s18, %s1235_s18  }
   0x5   : > { %s30_s26 = sadd.s32 1, %s1006_s22  ;;  %s162_s27 = sadd.s32 1, %s998_s20 }
   0x6   : > { %p32_p0 = scmp.ge.s32.totalorder %s30_s26, 8  ;;  %p172_p1 = scmp.ne.s32.totalorder %s998_s20, %s994_s19 }
   0x7   : > { %p173_p2 = scmp.eq.s32.totalorder %s772_s24, 7  ;;  %p178_p3 = scmp.ne.s32.totalorder %s994_s19, %s990_s18 }
   0x8   : > { %s1241_s26 = smov (%p32_p0, %s30_s26), 0  ;;  %p179_p5 = scmp.eq.s32.totalorder %s773_s25, 7 }
   0x9   : > { %p1085_p4 = por %p173_p2, %p172_p1  ;;  %s159_s29 = ssub.s32 %s1006_s22, %s1241_s26 }
   0xa   : > { %p779_p6 = scmp.ge.s32.totalorder %s1010_s23, 1  ;;  %p160_p7 = scmp.eq.s32.totalorder %s159_s29, 0 }
   0xb   : > { %p1092_p8 = por %p179_p5, %p178_p3  ;;  %p231_p9 = scmp.lt.s32.totalorder %s1010_s23, 9 }
   0xc   : > { %s1098_s6 = scalar_select %p160_p7, %s998_s20, %s162_s27  }
   0xd   : > { %p232_p10 = pnand %p779_p6, %p231_p9 }
   0xe   : > { %v904_v0 = vld [vmem:[%s1228_s1] sm:$0xff] (!%p232_p10)   ;;  %s781_s9 = sshll.u32 (!%p232_p10), %s1002_s21, 2  ;;  %v905_v1 = vld [vmem:[%s1228_s1 + $0x8] sm:$0xff] (!%p232_p10)   ;;  %vm337_vm0 = vcmask (!%p232_p10), 261120   ;;  %v910_v6 = vld [vmem:[%s1230_s3 + $0x10] sm:$0xff] (!%p232_p10)   ;;  %s268_s25 = sand.u32 (!%p232_p10), 1, %s994_s19  }
   0xf   : > { %235 = sbr.rel (%p232_p10) target bundleno = 527 (0x20f), region = 40  ;;  %p272_p11 = scmp.lt.s32.totalorder (!%p232_p10), %s781_s9, 31  ;;  %819 = vmatprep.subr.bf16.mxu0 (!%p232_p10), %v904_v0  ;;  %v908_v4 = vld [vmem:[%s1230_s3] sm:$0xff] (!%p232_p10)   ;;  %v909_v5 = vld [vmem:[%s1230_s3 + $0x8] sm:$0xff] (!%p232_p10)   ;;  %v911_v7 = vld [vmem:[%s1230_s3 + $0x18] sm:$0xff] (!%p232_p10)  }
  0x10   : > { %820 = vmatpush3.bf16.msra.mxu0 (!%p232_p10), %v904_v0  ;;  %827 = vmatprep.subr.bf16.mxu1 (!%p232_p10), %v908_v4  ;;  %v912_v8 = vld [vmem:[%s1230_s3 + $0x20] sm:$0xff] (!%p232_p10)   ;;  %v913_v9 = vld [vmem:[%s1230_s3 + $0x28] sm:$0xff] (!%p232_p10)   ;;  %v914_v10 = vld [vmem:[%s1230_s3 + $0x30] sm:$0xff] (!%p232_p10)   ;;  %s780_s27 = sshll.u32 (!%p232_p10), %s268_s25, 5  ;;  %s804_s10 = sshll.u32 (!%p232_p10), %s1002_s21, 9 }
  0x11   : > { %821 = vmatprep.subr.bf16.mxu0 (!%p232_p10), %v905_v1  ;;  %828 = vmatpush3.bf16.msra.mxu1 (!%p232_p10), %v908_v4  ;;  %v915_v11 = vld [vmem:[%s1230_s3 + $0x38] sm:$0xff] (!%p232_p10)   ;;  %v783_v12 = vld [vmem:[%s1229_s2] ss:$0 sm:$0xff] (!%p232_p10)  ;;  %s270_s8 = scalar_lea.vmem (!%p232_p10), [#allocation3], %s780_s27  ;;  %s1179_s13 = scalar_lea.hbm (!%p232_p10), %s1232_s5, %s804_s10 }
  0x12   : > { %829 = vmatprep.subr.bf16.mxu1 (!%p232_p10), %v909_v5  ;;  %s1181_s21 = scalar_lea.sflag (!%p232_p10), [#allocation4], %s268_s25 }
  0x14   : > { %822 = vmatpush3.bf16.msra.mxu0 (!%p232_p10), %v905_v1 }
  0x15   : > { %830 = vmatpush3.bf16.msra.mxu1 (!%p232_p10), %v909_v5 }
  0x16   : > { %s1243_s9 = smov (!%p272_p11, %s781_s9), 31  ;;  %831 = vmatprep.subr.bf16.mxu1 %v910_v6 }
  0x17   : > { %s782_s12 = sshll.u32 %s1243_s9, 2  ;;  %s660_s9 = sshll.u32 %s270_s8, 4  ;;  %s1174_s9 = int_to_ptr.vmem [resolvable:$true] %s660_s9 }
  0x18   : > { %s275_s15 = scalar_lea.vmem %s1227_s0, %s782_s12  ;;  %s932_s14 = scalar_lea.vmem %s1174_s9, 512 }
  0x19   : > { %v906_v2 = vld [vmem:[%s275_s15] sm:$0xff]   ;;  %v907_v3 = vld [vmem:[%s275_s15 + $0x8] sm:$0xff]   ;;  %832 = vmatpush3.bf16.msra.mxu1 %v910_v6  ;;  %p933_p12 = scmp.ne.s32.totalorder %s1174_s9, %s932_s14  ;;  %s1012_s15 = smov [#allocation3]  }
  0x1a   : > { %823 = vmatprep.mubr.msk.bf16.mxu0 %vm337_vm0, %v906_v2  ;;  %833 = vmatprep.subr.bf16.mxu1 %v911_v7  ;;  %s936_s16 = sshll.u32 %s1012_s15, 4  ;;  %s937_s16 = int_to_ptr.vmem [resolvable:$false] %s936_s16 }
  0x1b   : > { %824 = vmatmul.mubr.msk.bf16.vlgmr.msra.gmra.mrb[0].mxu0 %vm337_vm0, %v907_v3  ;;  %p934_p13 = pnand %p933_p12, %p1085_p4  ;;  %s938_s17 = scalar_lea.vmem %s937_s16, 1024 }
  0x1c   : > { %p939_p1 = scmp.lt.s32.totalorder %s1174_s9, %s937_s16  ;;  %p940_p2 = scmp.lt.s32.totalorder %s938_s17, %s932_s14 }
  0x1d   : > { %834 = vmatpush3.bf16.msra.mxu1 %v911_v7  ;;  %p935_p0 = pneg %p934_p13 }
  0x1e   : > { %835 = vmatprep.subr.bf16.mxu1 %v912_v8  ;;  %p941_p3 = por %p940_p2, %p939_p1 }
  0x20   : > { %p942_p5 = pnand %p941_p3, %p935_p0 }
  0x21   : > { %836 = vmatpush3.bf16.msra.mxu1 %v912_v8 }
  0x22   : > { %837 = vmatprep.subr.bf16.mxu1 %v913_v9 }
  0x25   : > { %838 = vmatpush3.bf16.msra.mxu1 %v913_v9 }
  0x26   : > { %839 = vmatprep.subr.bf16.mxu1 %v914_v10 }
  0x29   : > { %840 = vmatpush3.bf16.msra.mxu1 %v914_v10 }
  0x2a   : > { %841 = vmatprep.subr.bf16.mxu1 %v915_v11 }
  0x2d   : > { %842 = vmatpush3.bf16.msra.mxu1 %v915_v11 }
  0xee   : > { %v825_v13 = vpop.f32.mrb[0].mxu0 }
  0xef   : > { %v1137_v14 = vadd.f32 %v825_v13, %v783_v12  ;;  %v378_v15 = vpop.f32.mrb[1].mxu0 }
  0xf0   : > { %v1139_v16 = vadd.f32 %v783_v12, %v378_v15  ;;  %v826_v17 = vpop.f32.mrb[2].mxu0 }
  0xf1   : > { %v1142_v18 = vmul.f32 0.70710677, %v1137_v14  ;;  %v1144_v19 = vadd.f32 %v826_v17, %v783_v12  ;;  %v381_v20 = vpop.f32.mrb[3].mxu0 }
  0xf2   : > { %v1147_v21 = vmul.f32 0.70710677, %v1139_v16  ;;  %v1149_v22 = vadd.f32 %v783_v12, %v381_v20 }
  0xf3   : > { %v403_v23 = vand.u32 2147483647, %v1142_v18  ;;  %v1153_v24 = vmul.f32 0.70710677, %v1144_v19  ;;  %vm479_vm1 = vcmp.ge.f32.partialorder %v1142_v18, 0.0 }
  0xf4   : > { %v401_v25 = vand.u32 2147483647, %v1147_v21  ;;  %v1157_v26 = vmul.f32 0.70710677, %v1149_v22  ;;  %vm477_vm2 = vcmp.ge.f32.partialorder %v1147_v21, 0.0 }
  0xf5   : > { %v407_v27 = vmul.f32 0.3275911, %v403_v23  ;;  %v404_v28 = vand.u32 2147483647, %v1153_v24  ;;  %v455_v37 = vsub.f32 0.0, %v403_v23  ;;  %vm480_vm3 = vcmp.ge.f32.partialorder %v1153_v24, 0.0 }
  0xf6   : > { %v405_v29 = vmul.f32 0.3275911, %v401_v25  ;;  %v402_v30 = vand.u32 2147483647, %v1157_v26  ;;  %v453_v38 = vsub.f32 0.0, %v401_v25  ;;  %vm478_vm4 = vcmp.ge.f32.partialorder %v1157_v26, 0.0 }
  0xf7   : > { %v411_v31 = vadd.f32 1.0, %v407_v27  ;;  %v408_v32 = vmul.f32 0.3275911, %v404_v28  ;;  %v459_v40 = vmul.f32 %v455_v37, %v403_v23  ;;  %v456_v41 = vsub.f32 0.0, %v404_v28 }
  0xf8   : > { %v409_v33 = vadd.f32 1.0, %v405_v29  ;;  %v406_v34 = vmul.f32 0.3275911, %v402_v30  ;;  %v457_v44 = vmul.f32 %v453_v38, %v401_v25  ;;  %v454_v45 = vsub.f32 0.0, %v402_v30 }
  0xf9   : > { %916 = vrcp.f32 %v411_v31  ;;  %v412_v35 = vadd.f32 1.0, %v408_v32  ;;  %v465_v49 = vmul.f32 1.442695, %v459_v40  ;;  %v460_v50 = vmul.f32 %v456_v41, %v404_v28 }
  0xfa   : > { %918 = vrcp.f32 %v409_v33  ;;  %v410_v36 = vadd.f32 1.0, %v406_v34  ;;  %v461_v53 = vmul.f32 1.442695, %v457_v44  ;;  %v458_v56 = vmul.f32 %v454_v45, %v402_v30 }
  0xfb   : > { %920 = vrcp.f32 %v412_v35  ;;  %v467_v61 = vmul.f32 1.442695, %v460_v50 }
  0xfc   : > { %922 = vrcp.f32 %v410_v36  ;;  %v463_v2 = vmul.f32 1.442695, %v458_v56  ;;  %v393_v56 = vmul.f32 0.5, %v1139_v16 }
  0xfd   : > { %924 = vpow2.f32 %v465_v49 }
  0xfe   : > { %926 = vpow2.f32 %v461_v53 }
  0xff   : > { %928 = vpow2.f32 %v467_v61 }
 0x100   : > { %930 = vpow2.f32 %v463_v2 }
 0x103   : > { %v917_v39 = vpop.eup %916 }
 0x104   : > { %v919_v42 = vpop.eup %918  ;;  %v419_v43 = vmul.f32 1.0614054, %v917_v39 }
 0x105   : > { %v417_v46 = vmul.f32 1.0614054, %v919_v42  ;;  %v921_v48 = vpop.eup %920 }
 0x106   : > { %v423_v47 = vadd.f32 -1.4531521, %v419_v43  ;;  %v420_v54 = vmul.f32 1.0614054, %v921_v48  ;;  %v923_v55 = vpop.eup %922 }
 0x107   : > { %v421_v51 = vadd.f32 -1.4531521, %v417_v46  ;;  %v418_v60 = vmul.f32 1.0614054, %v923_v55  ;;  %v925_v27 = vpop.eup %924 }
 0x108   : > { %v427_v52 = vmul.f32 %v917_v39, %v423_v47  ;;  %v424_v59 = vadd.f32 -1.4531521, %v420_v54  ;;  %v927_v29 = vpop.eup %926  ;;  %v396_v54 = vmul.f32 0.5, %v1144_v19  ;;  %v798_v19 = vld [vmem:[%s1231_s4] ss:$0 sm:$0xff] }
 0x109   : > { %v425_v57 = vmul.f32 %v919_v42, %v421_v51  ;;  %v422_v1 = vadd.f32 -1.4531521, %v418_v60  ;;  %v929_v37 = vpop.eup %928 }
 0x10a   : > { %v431_v58 = vadd.f32 1.4214138, %v427_v52  ;;  %v428_v0 = vmul.f32 %v921_v48, %v424_v59  ;;  %v931_v44 = vpop.eup %930  ;;  %v394_v59 = vmul.f32 0.5, %v1149_v22 }
 0x10b   : > { %v429_v62 = vadd.f32 1.4214138, %v425_v57  ;;  %v426_v6 = vmul.f32 %v923_v55, %v422_v1 }
 0x10c   : > { %v435_v63 = vmul.f32 %v917_v39, %v431_v58  ;;  %v432_v5 = vadd.f32 1.4214138, %v428_v0 }
 0x10d   : > { %v433_v3 = vmul.f32 %v919_v42, %v429_v62  ;;  %v430_v10 = vadd.f32 1.4214138, %v426_v6 }
 0x10e   : > { %v439_v4 = vadd.f32 -0.28449672, %v435_v63  ;;  %v436_v9 = vmul.f32 %v921_v48, %v432_v5 }
 0x10f   : > { %v437_v7 = vadd.f32 -0.28449672, %v433_v3  ;;  %v434_v15 = vmul.f32 %v923_v55, %v430_v10 }
 0x110   : > { %v443_v8 = vmul.f32 %v917_v39, %v439_v4  ;;  %v440_v13 = vadd.f32 -0.28449672, %v436_v9 }
 0x111   : > { %v441_v11 = vmul.f32 %v919_v42, %v437_v7  ;;  %v438_v25 = vadd.f32 -0.28449672, %v434_v15 }
 0x112   : > { %v447_v12 = vadd.f32 0.2548296, %v443_v8  ;;  %v444_v23 = vmul.f32 %v921_v48, %v440_v13 }
 0x113   : > { %v445_v17 = vadd.f32 0.2548296, %v441_v11  ;;  %v442_v32 = vmul.f32 %v923_v55, %v438_v25 }
 0x114   : > { %v451_v20 = vmul.f32 %v917_v39, %v447_v12  ;;  %v448_v31 = vadd.f32 0.2548296, %v444_v23 }
 0x115   : > { %v449_v28 = vmul.f32 %v919_v42, %v445_v17  ;;  %v446_v36 = vadd.f32 0.2548296, %v442_v32 }
 0x116   : > { %v471_v30 = vmul.f32 %v925_v27, %v451_v20  ;;  %v452_v35 = vmul.f32 %v921_v48, %v448_v31  ;;  %v395_v48 = vmul.f32 0.5, %v1137_v14 }
 0x117   : > { %v469_v33 = vmul.f32 %v927_v29, %v449_v28  ;;  %v450_v43 = vmul.f32 %v923_v55, %v446_v36 }
 0x118   : > { %v475_v34 = vsub.f32 1.0, %v471_v30  ;;  %v472_v41 = vmul.f32 %v929_v37, %v452_v35 }
 0x119   : > { %v473_v38 = vsub.f32 1.0, %v469_v33  ;;  %v470_v42 = vmul.f32 %v931_v44, %v450_v43 }
 0x11a   : > { %v483_v40 = vsub.f32 0.0, %v475_v34  ;;  %v476_v46 = vsub.f32 1.0, %v472_v41 }
 0x11b   : > { %v481_v39 = vsub.f32 0.0, %v473_v38  ;;  %v474_v49 = vsub.f32 1.0, %v470_v42 }
 0x11c   : > { %v487_v45 = vsel %vm479_vm1, %v475_v34, %v483_v40  ;;  %v484_v47 = vsub.f32 0.0, %v476_v46 }
 0x11d   : > { %v485_v50 = vsel %vm477_vm2, %v473_v38, %v481_v39  ;;  %v491_v51 = vadd.f32 1.0, %v487_v45  ;;  %v482_v53 = vsub.f32 0.0, %v474_v49 }
 0x11e   : > { %v488_v52 = vsel %vm480_vm3, %v476_v46, %v484_v47  ;;  %v489_v55 = vadd.f32 1.0, %v485_v50 }
 0x11f   : > { %v492_v18 = vadd.f32 1.0, %v488_v52  ;;  %v486_v21 = vsel %vm478_vm4, %v474_v49, %v482_v53  ;;  %v495_v57 = vmul.f32 %v491_v51, %v395_v48 }
 0x120   : > { %v490_v24 = vadd.f32 1.0, %v486_v21  ;;  %v493_v60 = vmul.f32 %v489_v55, %v393_v56 }
 0x121   : > { %v496_v58 = vmul.f32 %v492_v18, %v396_v54 }
 0x122   : > { %v494_v14 = vmul.f32 %v490_v24, %v394_v59 }
 0x123   : > { %v502_v61 = vpack.c.bf16 %v496_v58, %v495_v57 }
 0x124   : > { %v501_v62 = vpack.c.bf16 %v494_v14, %v493_v60 }
 0x126   : > { %843 = vmatprep.mubr.bf16.mxu1 %v501_v62 }
 0x127   : > { %844 = vmatmul.mubr.bf16.vlgmr.msra.gmra.mrb[0].mxu1 %v502_v61 }
 0x1fa   : > { %v845_v16 = vpop.f32.mrb[0].mxu1 }
 0x1fb   : > { %v640_v26 = vadd.f32 %v845_v16, %v798_v19  ;;  %v601_v22 = vpop.f32.mrb[1].mxu1 }
 0x1fc   : > { %v638_v63 = vadd.f32 %v798_v19, %v601_v22  ;;  %v846_v0 = vpop.f32.mrb[2].mxu1 }
 0x1fd   : > { %644 = vst [vmem:[%s270_s8 + $0x10] sm:$0xff] %v640_v26  ;;  %v641_v1 = vadd.f32 %v846_v0, %v798_v19  ;;  %v604_v2 = vpop.f32.mrb[3].mxu1 }
 0x1fe   : > { %642 = vst [vmem:[%s270_s8] sm:$0xff] %v638_v63  ;;  %v639_v3 = vadd.f32 %v798_v19, %v604_v2 }
 0x1ff   : > { %645 = vst [vmem:[%s270_s8 + $0x18] sm:$0xff] %v641_v1 }
 0x200   : > { %643 = vst [vmem:[%s270_s8 + $0x8] sm:$0xff] %v639_v3 }
 0x201   : > { %945 = shalt.err (!%p942_p5)
}
 0x202   : > { %s946_s24 = scalar_lea.hbm %s1179_s13, 512  ;;  %s950_s29 = scalar_lea.hbm %s1232_s5, 4096 }
 0x203   : > { %p947_p6 = scmp.ne.s32.totalorder %s1179_s13, %s946_s24  ;;  %p951_p10 = scmp.lt.u32.totalorder %s1179_s13, %s1232_s5 }
 0x204   : > { %p952_p11 = scmp.lt.u32.totalorder %s950_s29, %s946_s24  ;;  %p954_p13 = scmp.lt.u32.totalorder %s946_s24, %s1179_s13 }
 0x205   : > { %p948_p7 = pnand %p947_p6, %p1085_p4 }
 0x206   : > { %p953_p12 = por %p952_p11, %p951_p10 }
 0x207   : > { %p949_p9 = pneg %p948_p7 }
 0x208   : > { %p955_p0 = por %p954_p13, %p953_p12 }
 0x20a   : > { %p956_p1 = pnand %p955_p0, %p949_p9 }
 0x20c   : > { %959 = shalt.err (!%p956_p1)
}
 0x20d   : > { %s1013_s10 = smov 128   ;;  %s1014_s11 = smov 8  }
 0x20e   : > { %847 = dma.vmem_to_hbm [thread:$0]  (%p1085_p4), %s1174_s9, 512, %s1179_s13, %s1181_s21, %s1013_s10, %s1013_s10, %s1014_s11  }
 0x20f PF: > { %p853_p2 = scmp.ge.s32.totalorder %s1010_s23, 2  ;;  %s675_s12 = sand.u32 1, %s990_s18  }
 0x210   : > { %s676_s14 = scalar_lea.sflag [#allocation4], %s675_s12 }
 0x211   : > { %p850_p3 = pnand %p853_p2, %p1092_p8 }
 0x213   : > { %985 = dma.done.wait (!%p850_p3), %s676_s14, 512  }
 0x214   : > { %987 = vsyncadd (!%p850_p3), %s676_s14, 4294966784  ;;  %s18_s23 = sadd.s32 1, %s1010_s23   ;;  %s1235_s18 = smov %s994_s19 }
 0x215   : > { %p15_p5 = scmp.ge.s32.totalorder %s18_s23, 10   ;;  %s1236_s19 = smov %s998_s20 }
 0x216   : > { %s1237_s20 = smov %s1098_s6  ;;  %s1238_s21 = smov %s1006_s22 }
 0x217   : > { %s1239_s22 = smov %s1241_s26  ;;  %17 = sbr.rel (!%p15_p5) target bundleno = 4 (0x4), region = 92 }
 0x21e   :  { %681 = vsyncpa [#allocation4], 1 }
 0x21f   :  { %683 = vsyncpa [#allocation4 + $0x1], 1 }

</bundles_post_ra>
